<compile_context>
chip_gen: v6e
topology: v6e:2x2x1
jax: 0.10.0
libtpu: 0.0.40
codegen_flags: <defaults>
</compile_context>

<pallas_src>
import functools

import jax
import jax.numpy as jnp
from jax.experimental import pallas as pl
from jax.experimental.pallas import tpu as pltpu


def _round_up(a, b):
    return (a + b - 1) // b * b


def _vmem_capacity_bytes():
    """Per-core VMEM capacity; conservative v7x default if the query fails."""
    try:
        return int(pltpu.get_tpu_info().vmem_capacity_bytes)
    except Exception:
        return 64 << 20


def _working_set_bytes(tm, K, Cp):
    # Worst pass: bf16 xcol double-buffered + bf16 weight (assume 2 bufs in
    # case single-buffering is unavailable) + f32 out tile + bf16 y tile.
    return (2 * tm * K * 2 + 2 * K * Cp * 2
            + 2 * tm * Cp * 4 + 2 * tm * Cp * 2 + (64 << 10))


def _pick_tile_m(M, K, Cp, budget, block_m=None):
    if block_m is None:
        # Bigger tiles for shallow layers (amortize per-grid-step overhead);
        # the VMEM budget below shrinks them again for deep layers / v7x.
        block_m = 1024 if K <= 2048 else 512
    tm = max(16, _round_up(min(block_m, M), 16))       # bf16 sublane packing
    while tm > 16 and _working_set_bytes(tm, K, Cp) > budget:
        tm = max(16, _round_up(tm // 2, 16))
    return tm


def _vmem_limit_bytes(ws, cap):
    return int(min(3 * cap // 4, max(2 * ws, 32 << 20)))


# ------------------------------- kernels ---------------------------------- #

def _matmul_stats_kernel(xcol_ref, w_ref, y_ref, stats_ref):
    """Deep-layer pass 1: matmul, store y in bf16, emit per-tile BN partials."""
    y = jnp.dot(xcol_ref[...], w_ref[...],
                preferred_element_type=jnp.float32)            # (TM, Cp) f32
    y_ref[...] = y.astype(y_ref.dtype)                         # bf16 round trip
    stats_ref[0, 0:1, :] = jnp.sum(y, axis=0, keepdims=True)   # f32 sums
    stats_ref[0, 1:2, :] = jnp.sum(y * y, axis=0, keepdims=True)


def _stats_only_kernel(xcol_ref, w_ref, stats_ref):
    """Shallow-layer pass 1: per-tile BN partial sums only (no y round trip)."""
    y = jnp.dot(xcol_ref[...], w_ref[...],
                preferred_element_type=jnp.float32)
    stats_ref[0, 0:1, :] = jnp.sum(y, axis=0, keepdims=True)
    stats_ref[0, 1:2, :] = jnp.sum(y * y, axis=0, keepdims=True)


def _matmul_affine_act_kernel(xcol_ref, w_ref, scale_ref, shift_ref, o_ref, *,
                              slope):
    """Shallow-layer pass 2: recompute matmul, folded BN affine + LeakyReLU."""
    y = jnp.dot(xcol_ref[...], w_ref[...],
                preferred_element_type=jnp.float32)
    y = y * scale_ref[...] + shift_ref[...]
    o_ref[...] = jnp.where(y >= 0, y, slope * y).astype(o_ref.dtype)


def _affine_act_kernel(y_ref, scale_ref, shift_ref, o_ref, *, slope):
    """Deep-layer pass 2: folded BN affine + LeakyReLU on stored bf16 y."""
    y = y_ref[...].astype(jnp.float32)
    y = y * scale_ref[...] + shift_ref[...]
    o_ref[...] = jnp.where(y >= 0, y, slope * y).astype(o_ref.dtype)


def _matmul_act_kernel(xcol_ref, w_ref, o_ref, *, slope):
    """normalize=False: single fused matmul + LeakyReLU pass."""
    y = jnp.dot(xcol_ref[...], w_ref[...],
                preferred_element_type=jnp.float32)
    o_ref[...] = jnp.where(y >= 0, y, slope * y).astype(o_ref.dtype)


# ------------------------------- wrapper ----------------------------------- #

def unet_down(x, weight, gamma=None, beta=None, *, normalize=True, eps=1e-5,
              slope=0.2, block_m=None, channels_last=False,
              recompute_k_threshold=2048):
    """x: (N, Cin, H, W) NCHW; weight: (Cout, Cin, 4, 4) (PyTorch OIHW).

    Returns NCHW by default (PyTorch semantics); channels_last=True returns the
    lane-dense NHWC result and skips the extra HBM transpose (preferred when
    stacking UNetDown layers - the next layer's im2col wants NHWC anyway).
    """
    N, Cin, H, W = x.shape
    Cout = weight.shape[0]
    assert weight.shape == (Cout, Cin, 4, 4)
    assert H % 2 == 0 and W % 2 == 0
    OH, OW = H // 2, W // 2
    out_dtype = x.dtype

    # ---- im2col glue (plain JAX): one NHWC transpose, pad once, 16 strided
    # taps concatenated on the lane axis, column order (kh, kw, ci).
    # TODO(synk): do this in-kernel (see module header) to kill the HBM xcol.
    x_nhwc = jnp.transpose(x, (0, 2, 3, 1)).astype(jnp.bfloat16)
    xp = jnp.pad(x_nhwc, ((0, 0), (1, 1), (1, 1), (0, 0)))
    taps = [xp[:, kh:kh + 2 * OH:2, kw:kw + 2 * OW:2, :]
            for kh in range(4) for kw in range(4)]
    xcol = jnp.concatenate(taps, axis=-1).reshape(N * OH * OW, 16 * Cin)

    # Lane-dense output: pad Cout with zero weight columns to a multiple of 128
    # so every y / out store is a full-lane (unmasked) vst.
    Cp = _round_up(max(Cout, 128), 128)
    wmat = jnp.transpose(weight, (2, 3, 1, 0)).reshape(16 * Cin, Cout)
    wmat = wmat.astype(jnp.bfloat16)
    if Cp != Cout:
        wmat = jnp.pad(wmat, ((0, 0), (0, Cp - Cout)))

    M, K = xcol.shape
    cap = _vmem_capacity_bytes()
    TM = _pick_tile_m(M, K, Cp, cap // 2, block_m)
    M_pad = _round_up(M, TM)
    if M_pad != M:
        # Zero rows contribute nothing to the BN sums (we divide by the true M)
        # and are sliced off at the end.
        xcol = jnp.pad(xcol, ((0, M_pad - M), (0, 0)))
    nt = M_pad // TM

    ws = _working_set_bytes(TM, K, Cp)
    cparams = pltpu.CompilerParams(
        dimension_semantics=("parallel",),
        vmem_limit_bytes=_vmem_limit_bytes(ws, cap))

    xcol_spec = pl.BlockSpec((TM, K), lambda i: (i, 0))
    out_spec = pl.BlockSpec((TM, Cp), lambda i: (i, 0))

    def wspec(single_buffer):
        # Constant index_map -> weight stays VMEM-resident; Buffered(1) avoids
        # a redundant second weight buffer (saves K*Cp*2 bytes of VMEM).
        if single_buffer:
            return pl.BlockSpec((K, Cp), lambda i: (0, 0),
                                pipeline_mode=pl.Buffered(1))
        return pl.BlockSpec((K, Cp), lambda i: (0, 0))

    def with_weight_fallback(build):
        # Fall back to the default (double-buffered) weight spec if this jax
        # version rejects pipeline_mode / Buffered(1).  (Only effective when
        # called eagerly; under jit the default path is still correct.)
        try:
            return build(True)
        except Exception:
            return build(False)

    if not normalize:
        def run_nonorm(sb):
            return pl.pallas_call(
                functools.partial(_matmul_act_kernel, slope=slope),
                out_shape=jax.ShapeDtypeStruct((M_pad, Cp), out_dtype),
                grid=(nt,),
                in_specs=[xcol_spec, wspec(sb)],
                out_specs=out_spec,
                compiler_params=cparams,
            )(xcol, wmat)
        out = with_weight_fallback(run_nonorm)
    else:
        assert gamma is not None and beta is not None
        gamma_p = jnp.pad(gamma.astype(jnp.float32), (0, Cp - Cout))
        beta_p = jnp.pad(beta.astype(jnp.float32), (0, Cp - Cout))

        stats_spec = pl.BlockSpec((1, 2, Cp), lambda i: (i, 0, 0))
        recompute = K <= recompute_k_threshold

        # -------- pass 1: matmul + per-tile BN partial sums ---------------- #
        if recompute:
            # Shallow layer: re-reading xcol in pass 2 is much cheaper than a
            # stored-y round trip, so emit stats only.
            def run_stats(sb):
                return pl.pallas_call(
                    _stats_only_kernel,
                    out_shape=jax.ShapeDtypeStruct((nt, 2, Cp), jnp.float32),
                    grid=(nt,),
                    in_specs=[xcol_spec, wspec(sb)],
                    out_specs=stats_spec,
                    compiler_params=cparams,
                )(xcol, wmat)
            partial = with_weight_fallback(run_stats)
            y = None
        else:
            # Deep layer: store y once, in bf16 (halves the inter-pass HBM
            # traffic); stats still come from the f32 accumulator.
            def run_stats(sb):
                return pl.pallas_call(
                    _matmul_stats_kernel,
                    out_shape=(jax.ShapeDtypeStruct((M_pad, Cp), jnp.bfloat16),
                               jax.ShapeDtypeStruct((nt, 2, Cp), jnp.float32)),
                    grid=(nt,),
                    in_specs=[xcol_spec, wspec(sb)],
                    out_specs=(out_spec, stats_spec),
                    compiler_params=cparams,
                )(xcol, wmat)
            y, partial = with_weight_fallback(run_stats)

        # ---- fold mean/var/gamma/beta into one per-channel affine (tiny) -- #
        # NOTE: var = E[y^2] - E[y]^2 in f32 from the f32 MXU accumulator;
        # adequate at the validated 2e-2 tolerance (documented in review).
        stats = jnp.sum(partial, axis=0)                 # (2, Cp) f32
        mean = stats[0] / M
        var = jnp.maximum(stats[1] / M - mean * mean, 0.0)   # biased (training)
        scale = gamma_p * jax.lax.rsqrt(var + eps)
        shift = beta_p - mean * scale
        scale = scale.reshape(1, Cp)
        shift = shift.reshape(1, Cp)
        cc_spec = pl.BlockSpec((1, Cp), lambda i: (0, 0))

        # -------- pass 2: (re)apply conv result + affine + LeakyReLU ------- #
        if recompute:
            def run_out(sb):
                return pl.pallas_call(
                    functools.partial(_matmul_affine_act_kernel, slope=slope),
                    out_shape=jax.ShapeDtypeStruct((M_pad, Cp), out_dtype),
                    grid=(nt,),
                    in_specs=[xcol_spec, wspec(sb), cc_spec, cc_spec],
                    out_specs=out_spec,
                    compiler_params=cparams,
                )(xcol, wmat, scale, shift)
            out = with_weight_fallback(run_out)
        else:
            out = pl.pallas_call(
                functools.partial(_affine_act_kernel, slope=slope),
                out_shape=jax.ShapeDtypeStruct((M_pad, Cp), out_dtype),
                grid=(nt,),
                in_specs=[out_spec, cc_spec, cc_spec],
                out_specs=out_spec,
                compiler_params=cparams,
            )(y, scale, shift)

    out = out[:M, :Cout].reshape(N, OH, OW, Cout)        # lane-dense NHWC
    if channels_last:
        return out
    return jnp.transpose(out, (0, 3, 1, 2))              # PyTorch NCHW layout


# ------------------------------ reference ---------------------------------- #

def _reference(x, weight, gamma, beta, *, eps=1e-5, slope=0.2):
    """Plain-JAX reference mirroring the PyTorch forward (training-mode BN)."""
    y = jax.lax.conv_general_dilated(
        x, weight, window_strides=(2, 2), padding=((1, 1), (1, 1)),
        dimension_numbers=("NCHW", "OIHW", "NCHW"))
    mean = jnp.mean(y, axis=(0, 2, 3), keepdims=True)
    var = jnp.mean(jnp.square(y - mean), axis=(0, 2, 3), keepdims=True)
    y = (y - mean) * jax.lax.rsqrt(var + eps)
    y = y * gamma.reshape(1, -1, 1, 1) + beta.reshape(1, -1, 1, 1)
    return jnp.where(y >= 0, y, slope * y)


if __name__ == "__main__":
    N, Cin, H, W = 2, 4, 16, 16
    Cout = 8

    key = jax.random.PRNGKey(0)
    kx, kw, kg, kb = jax.random.split(key, 4)

    x = jax.random.normal(kx, (N, Cin, H, W), dtype=jnp.float32)
    weight = jax.random.normal(kw, (Cout, Cin, 4, 4), dtype=jnp.float32) * 0.1
    gamma = 1.0 + 0.1 * jax.random.normal(kg, (Cout,), dtype=jnp.float32)
    beta = 0.1 * jax.random.normal(kb, (Cout,), dtype=jnp.float32)

    ref = _reference(x, weight, gamma, beta)

    # Default path (small K -> stats-only pass 1, fused recompute pass 2).
    out = jax.block_until_ready(unet_down(x, weight, gamma, beta))
    assert out.shape == (N, Cout, H // 2, W // 2), out.shape
    assert jnp.allclose(out, ref, atol=2e-2, rtol=2e-2), (
        float(jnp.max(jnp.abs(out - ref))))

    # Stored-y (bf16 intermediate) path, as used for deep layers.
    out2 = jax.block_until_ready(
        unet_down(x, weight, gamma, beta, recompute_k_threshold=0))
    assert jnp.allclose(out2, ref, atol=2e-2, rtol=2e-2), (
        float(jnp.max(jnp.abs(out2 - ref))))

    # normalize=False path.
    y_ref = jax.lax.conv_general_dilated(
        x, weight, window_strides=(2, 2), padding=((1, 1), (1, 1)),
        dimension_numbers=("NCHW", "OIHW", "NCHW"))
    ref_nn = jnp.where(y_ref >= 0, y_ref, 0.2 * y_ref)
    out_nn = jax.block_until_ready(
        unet_down(x, weight, gamma, beta, normalize=False))
    assert jnp.allclose(out_nn, ref_nn, atol=2e-2, rtol=2e-2), (
        float(jnp.max(jnp.abs(out_nn - ref_nn))))

    print("KERNEL_OK")
</pallas_src>

<mosaic_0001>
module attributes {stable_mosaic.version = 11 : i64} {
  func.func @_stats_only_kernel(%arg0: i32, %arg1: memref<128x64xbf16, #tpu.memory_space<vmem>>, %arg2: memref<64x128xbf16, #tpu.memory_space<vmem>>, %arg3: memref<1x2x128xf32, #tpu.memory_space<vmem>>) attributes {dimension_semantics = [#tpu.dimension_semantics<parallel>], iteration_bounds = array<i64: 1>, scalar_prefetch = 0 : i64, scratch_operands = 0 : i64, tpu.core_type = #tpu.core_type<tc>, window_params = [{transform_indices = @transform_0, window_bounds = array<i64: 128, 64>}, {pipeline_mode = #tpu.pipeline_mode<synchronous>, transform_indices = @transform_1, window_bounds = array<i64: 64, 128>}, {transform_indices = @transform_2, window_bounds = array<i64: 1, 2, 128>}]} {
    %c0 = arith.constant 0 : index
    %c0_0 = arith.constant 0 : index
    %0 = vector.load %arg1[%c0, %c0_0] : memref<128x64xbf16, #tpu.memory_space<vmem>>, vector<128x64xbf16>
    %c0_1 = arith.constant 0 : index
    %c0_2 = arith.constant 0 : index
    %1 = vector.load %arg2[%c0_1, %c0_2] : memref<64x128xbf16, #tpu.memory_space<vmem>>, vector<64x128xbf16>
    %cst = arith.constant dense<0.000000e+00> : vector<128x128xf32>
    %2 = tpu.matmul %0, %1, %cst {dimension_numbers = #tpu.dot_dimension_numbers<[1], [0], [0], [1], [0, 0, 1, 1], [], []>} : vector<128x64xbf16>, vector<64x128xbf16>, vector<128x128xf32> -> vector<128x128xf32>
    %cst_3 = arith.constant dense<0.000000e+00> : vector<128xf32>
    %3 = vector.multi_reduction <add>, %2, %cst_3 [0] : vector<128x128xf32> to vector<128xf32>
    %4 = vector.shape_cast %3 : vector<128xf32> to vector<1x128xf32>
    %c0_4 = arith.constant 0 : index
    %c0_5 = arith.constant 0 : index
    %c0_6 = arith.constant 0 : index
    %5 = vector.load %arg3[%c0_4, %c0_5, %c0_6] : memref<1x2x128xf32, #tpu.memory_space<vmem>>, vector<1x1x128xf32>
    %6 = vector.shape_cast %5 : vector<1x1x128xf32> to vector<1x128xf32>
    %7 = vector.shape_cast %4 : vector<1x128xf32> to vector<1x1x128xf32>
    tpu.vector_store %arg3[%c0_4, %c0_5, %c0_6], %7 {strides = array<i32>} : memref<1x2x128xf32, #tpu.memory_space<vmem>>, vector<1x1x128xf32>,
    %8 = arith.mulf %2, %2 : vector<128x128xf32>
    %cst_7 = arith.constant dense<0.000000e+00> : vector<128xf32>
    %9 = vector.multi_reduction <add>, %8, %cst_7 [0] : vector<128x128xf32> to vector<128xf32>
    %10 = vector.shape_cast %9 : vector<128xf32> to vector<1x128xf32>
    %c0_8 = arith.constant 0 : index
    %c1 = arith.constant 1 : index
    %c0_9 = arith.constant 0 : index
    %11 = vector.load %arg3[%c0_8, %c1, %c0_9] : memref<1x2x128xf32, #tpu.memory_space<vmem>>, vector<1x1x128xf32>
    %12 = vector.shape_cast %11 : vector<1x1x128xf32> to vector<1x128xf32>
    %13 = vector.shape_cast %10 : vector<1x128xf32> to vector<1x1x128xf32>
    tpu.vector_store %arg3[%c0_8, %c1, %c0_9], %13 {strides = array<i32>} : memref<1x2x128xf32, #tpu.memory_space<vmem>>, vector<1x1x128xf32>,
    return
  }
  func.func @transform_0(%arg0: i32) -> (i32, i32) {
    %c0_i32 = arith.constant 0 : i32
    %c0_i32_0 = arith.constant 0 : i32
    return %arg0, %c0_i32 : i32, i32
  }
  func.func @transform_1(%arg0: i32) -> (i32, i32) {
    %c0_i32 = arith.constant 0 : i32
    %c0_i32_0 = arith.constant 0 : i32
    %c0_i32_1 = arith.constant 0 : i32
    return %c0_i32, %c0_i32_0 : i32, i32
  }
  func.func @transform_2(%arg0: i32) -> (i32, i32, i32) {
    %c0_i32 = arith.constant 0 : i32
    %c0_i32_0 = arith.constant 0 : i32
    %c0_i32_1 = arith.constant 0 : i32
    return %arg0, %c0_i32, %c0_i32_0 : i32, i32, i32
  }
}

module attributes {stable_mosaic.version = 11 : i64} {
  func.func @_stats_only_kernel(%arg0: i32, %arg1: memref<128x64xbf16, #tpu.memory_space<vmem>>, %arg2: memref<64x128xbf16, #tpu.memory_space<vmem>>, %arg3: memref<1x2x128xf32, #tpu.memory_space<vmem>>) attributes {dimension_semantics = [#tpu.dimension_semantics<parallel>], iteration_bounds = array<i64: 1>, scalar_prefetch = 0 : i64, scratch_operands = 0 : i64, tpu.core_type = #tpu.core_type<tc>, window_params = [{transform_indices = @transform_0, window_bounds = array<i64: 128, 64>}, {pipeline_mode = #tpu.pipeline_mode<synchronous>, transform_indices = @transform_1, window_bounds = array<i64: 64, 128>}, {transform_indices = @transform_2, window_bounds = array<i64: 1, 2, 128>}]} {
    %c0 = arith.constant 0 : index
    %c0_0 = arith.constant 0 : index
    %0 = vector.load %arg1[%c0, %c0_0] : memref<128x64xbf16, #tpu.memory_space<vmem>>, vector<128x64xbf16>
    %c0_1 = arith.constant 0 : index
    %c0_2 = arith.constant 0 : index
    %1 = vector.load %arg2[%c0_1, %c0_2] : memref<64x128xbf16, #tpu.memory_space<vmem>>, vector<64x128xbf16>
    %cst = arith.constant dense<0.000000e+00> : vector<128x128xf32>
    %2 = tpu.matmul %0, %1, %cst {dimension_numbers = #tpu.dot_dimension_numbers<[1], [0], [0], [1], [0, 0, 1, 1], [], []>} : vector<128x64xbf16>, vector<64x128xbf16>, vector<128x128xf32> -> vector<128x128xf32>
    %cst_3 = arith.constant dense<0.000000e+00> : vector<128xf32>
    %3 = vector.multi_reduction <add>, %2, %cst_3 [0] : vector<128x128xf32> to vector<128xf32>
    %4 = vector.shape_cast %3 : vector<128xf32> to vector<1x128xf32>
    %c0_4 = arith.constant 0 : index
    %c0_5 = arith.constant 0 : index
    %c0_6 = arith.constant 0 : index
    %5 = vector.load %arg3[%c0_4, %c0_5, %c0_6] : memref<1x2x128xf32, #tpu.memory_space<vmem>>, vector<1x1x128xf32>
    %6 = vector.shape_cast %5 : vector<1x1x128xf32> to vector<1x128xf32>
    %7 = vector.shape_cast %4 : vector<1x128xf32> to vector<1x1x128xf32>
    tpu.vector_store %arg3[%c0_4, %c0_5, %c0_6], %7 {strides = array<i32>} : memref<1x2x128xf32, #tpu.memory_space<vmem>>, vector<1x1x128xf32>,
    %8 = arith.mulf %2, %2 : vector<128x128xf32>
    %cst_7 = arith.constant dense<0.000000e+00> : vector<128xf32>
    %9 = vector.multi_reduction <add>, %8, %cst_7 [0] : vector<128x128xf32> to vector<128xf32>
    %10 = vector.shape_cast %9 : vector<128xf32> to vector<1x128xf32>
    %c0_8 = arith.constant 0 : index
    %c1 = arith.constant 1 : index
    %c0_9 = arith.constant 0 : index
    %11 = vector.load %arg3[%c0_8, %c1, %c0_9] : memref<1x2x128xf32, #tpu.memory_space<vmem>>, vector<1x1x128xf32>
    %12 = vector.shape_cast %11 : vector<1x1x128xf32> to vector<1x128xf32>
    %13 = vector.shape_cast %10 : vector<1x128xf32> to vector<1x1x128xf32>
    tpu.vector_store %arg3[%c0_8, %c1, %c0_9], %13 {strides = array<i32>} : memref<1x2x128xf32, #tpu.memory_space<vmem>>, vector<1x1x128xf32>,
    return
  }
  func.func @transform_0(%arg0: i32) -> (i32, i32) {
    %c0_i32 = arith.constant 0 : i32
    %c0_i32_0 = arith.constant 0 : i32
    return %arg0, %c0_i32 : i32, i32
  }
  func.func @transform_1(%arg0: i32) -> (i32, i32) {
    %c0_i32 = arith.constant 0 : i32
    %c0_i32_0 = arith.constant 0 : i32
    %c0_i32_1 = arith.constant 0 : i32
    return %c0_i32, %c0_i32_0 : i32, i32
  }
  func.func @transform_2(%arg0: i32) -> (i32, i32, i32) {
    %c0_i32 = arith.constant 0 : i32
    %c0_i32_0 = arith.constant 0 : i32
    %c0_i32_1 = arith.constant 0 : i32
    return %arg0, %c0_i32, %c0_i32_0 : i32, i32, i32
  }
}

</mosaic_0001>

<bundles_post_ra>
// kernel: tpu_custom_call.1
= control target key start
LH: loop header
LB: loop body
LE: loop exit
PB: predicated region body
PF: predicated region fallthrough
CT: control target
= control target key end

     0   :  { %vm101_vm0 = vcmask 523264   ;;  %s459_s0 = inlined_call_operand.vmem [shape: bf16[128,64], index: 0, kind: input, shape index: {}]   ;;  %s460_s1 = inlined_call_operand.vmem [shape: bf16[64,128], index: 1, kind: input, shape index: {}]   ;;  %s461_s2 = inlined_call_operand.hbm [shape: f32[1,2,128], index: 2, kind: output, shape index: {}]  }
   0x1   :  { %v362_v0 = vld [vmem:[%s460_s1 + $0x18] sm:$0xff]   ;;  %v363_v1 = vld [vmem:[%s460_s1 + $0x10] sm:$0xff]   ;;  %v364_v2 = vld [vmem:[%s460_s1 + $0x8] sm:$0xff]  }
   0x2   :  { %329 = vmatprep.subr.bf16.mxu0 %v362_v0  ;;  %353 = vmatprep.subr.bf16.mxu1 %v362_v0  ;;  %v366_v3 = vld [vmem:[%s459_s0] sm:$0xff]  }
   0x3   :  { %330 = vmatpush3.bf16.msra.mxu0 %v362_v0  ;;  %357 = vmatpush3.bf16.msra.mxu1 %v362_v0  ;;  %v365_v4 = vld [vmem:[%s460_s1] sm:$0xff]  }
   0x4   :  { %331 = vmatprep.subr.bf16.mxu0 %v363_v1  ;;  %354 = vmatprep.subr.bf16.mxu1 %v363_v1  ;;  %v370_v5 = vld [vmem:[%s459_s0 + $0x20] sm:$0xff]  }
   0x5   :  { %337 = vmatprep.mubr.msk.bf16.mxu0 %vm101_vm0, %v366_v3  ;;  %345 = vmatprep.mubr.msk.bf16.mxu1 %vm101_vm0, %v370_v5 }
   0x7   :  { %332 = vmatpush3.bf16.msra.mxu0 %v363_v1  ;;  %358 = vmatpush3.bf16.msra.mxu1 %v363_v1 }
   0x8   :  { %333 = vmatprep.subr.bf16.mxu0 %v364_v2  ;;  %355 = vmatprep.subr.bf16.mxu1 %v364_v2 }
   0xb   :  { %334 = vmatpush3.bf16.msra.mxu0 %v364_v2  ;;  %359 = vmatpush3.bf16.msra.mxu1 %v364_v2 }
   0xc   :  { %335 = vmatprep.subr.bf16.mxu0 %v365_v4  ;;  %356 = vmatprep.subr.bf16.mxu1 %v365_v4 }
   0xd   :  { %7 = vsyncpa [#allocation3], 0  ;;  %v367_v6 = vld [vmem:[%s459_s0 + $0x8] sm:$0xff]   ;;  %v368_v8 = vld [vmem:[%s459_s0 + $0x10] sm:$0xff]  }
   0xe   :  { %v371_v7 = vld [vmem:[%s459_s0 + $0x28] sm:$0xff]   ;;  %v372_v9 = vld [vmem:[%s459_s0 + $0x30] sm:$0xff]   ;;  %v369_v10 = vld [vmem:[%s459_s0 + $0x18] sm:$0xff]  }
   0xf   :  { %336 = vmatpush3.bf16.msra.mxu0 %v365_v4  ;;  %360 = vmatpush3.bf16.msra.mxu1 %v365_v4  ;;  %v373_v11 = vld [vmem:[%s459_s0 + $0x38] sm:$0xff]   ;;  %s396_s0 = smov [#allocation2]  }
  0x10   :  { %s289_s4 = sshll.u32 %s396_s0, 4  ;;  %s290_s4 = int_to_ptr.vmem [resolvable:$true] %s289_s4 }
  0x11   :  { %s374_s5 = scalar_lea.vmem %s290_s4, 32  ;;  %p379_p1 = scmp.lt.s32.totalorder %s290_s4, %s290_s4 }
  0x12   :  { %338 = vmatmul.mubr.msk.bf16.vlgmr.msra.gmra.mxu0 %vm101_vm0, %v367_v6  ;;  %346 = vmatmul.mubr.msk.bf16.vlgmr.msra.gmra.mxu1 %vm101_vm0, %v371_v7  ;;  %p375_p0 = scmp.ne.s32.totalorder %s290_s4, %s374_s5  ;;  %p380_p2 = scmp.lt.s32.totalorder %s374_s5, %s374_s5 }
  0x13   :  { %341 = vmatprep.mubr.msk.bf16.mxu0 %vm101_vm0, %v368_v8  ;;  %349 = vmatprep.mubr.msk.bf16.mxu1 %vm101_vm0, %v372_v9 }
  0x14   :  { %p381_p3 = por %p380_p2, %p379_p1 }
  0x16   :  { %p382_p4 = pnand %p381_p3, %p375_p0 }
  0x1a   :  { %342 = vmatmul.mubr.msk.bf16.gmra.mxu0 %vm101_vm0, %v369_v10  ;;  %350 = vmatmul.mubr.msk.bf16.gmra.mxu1 %vm101_vm0, %v373_v11 }
  0xd2   :  { %v339_v12 = vpop.f32.mrf.mxu0  ;;  %v347_v13 = vpop.f32.mrf.mxu1 }
  0xd3   :  { %v247_v23 = vmul.f32 %v339_v12, %v339_v12  ;;  %v255_v54 = vmul.f32 %v347_v13, %v347_v13 }
  0xd4   :  { %v160_v14 = vpop.f32.mrf.mxu0  ;;  %v192_v16 = vpop.f32.mrf.mxu1 }
  0xd5   :  { %v245_v18 = vmul.f32 %v160_v14, %v160_v14  ;;  %v253_v47 = vmul.f32 %v192_v16, %v192_v16 }
  0xd6   :  { %v340_v15 = vpop.f32.mrf.mxu0  ;;  %v348_v22 = vpop.f32.mrf.mxu1 }
  0xd7   :  { %v248_v27 = vmul.f32 %v340_v15, %v340_v15  ;;  %v256_v57 = vmul.f32 %v348_v22, %v348_v22 }
  0xd8   :  { %v163_v17 = vpop.f32.mrf.mxu0  ;;  %v195_v31 = vpop.f32.mrf.mxu1 }
  0xd9   :  { %v223_v19 = vadd.f32 %v163_v17, %v160_v14  ;;  %v246_v20 = vmul.f32 %v163_v17, %v163_v17  ;;  %v254_v51 = vmul.f32 %v195_v31, %v195_v31 }
  0xda   :  { %v343_v21 = vpop.f32.mrf.mxu0  ;;  %v351_v39 = vpop.f32.mrf.mxu1 }
  0xdb   :  { %v224_v24 = vadd.f32 %v339_v12, %v223_v19  ;;  %v261_v25 = vadd.f32 %v246_v20, %v245_v18  ;;  %v251_v40 = vmul.f32 %v343_v21, %v343_v21  ;;  %v259_v3 = vmul.f32 %v351_v39, %v351_v39 }
  0xdc   :  { %v176_v26 = vpop.f32.mrf.mxu0  ;;  %v208_v46 = vpop.f32.mrf.mxu1 }
  0xdd   :  { %v262_v28 = vadd.f32 %v261_v25, %v247_v23  ;;  %v225_v29 = vadd.f32 %v340_v15, %v224_v24  ;;  %v249_v33 = vmul.f32 %v176_v26, %v176_v26  ;;  %v257_v62 = vmul.f32 %v208_v46, %v208_v46 }
  0xde   :  { %v344_v30 = vpop.f32.mrf.mxu0  ;;  %v352_v53 = vpop.f32.mrf.mxu1 }
  0xdf   :  { %v226_v32 = vadd.f32 %v225_v29, %v176_v26  ;;  %v263_v34 = vadd.f32 %v262_v28, %v248_v27  ;;  %v252_v43 = vmul.f32 %v344_v30, %v344_v30  ;;  %v260_v6 = vmul.f32 %v352_v53, %v352_v53 }
  0xe0   :  { %v179_v35 = vpop.f32.mrf.mxu0  ;;  %v211_v60 = vpop.f32.mrf.mxu1 }
  0xe1   :  { %v264_v36 = vadd.f32 %v263_v34, %v249_v33  ;;  %v227_v37 = vadd.f32 %v226_v32, %v179_v35  ;;  %v250_v38 = vmul.f32 %v179_v35, %v179_v35  ;;  %v258_v2 = vmul.f32 %v211_v60, %v211_v60 }
  0xe3   :  { %v228_v41 = vadd.f32 %v343_v21, %v227_v37  ;;  %v265_v42 = vadd.f32 %v264_v36, %v250_v38 }
  0xe5   :  { %v229_v44 = vadd.f32 %v344_v30, %v228_v41  ;;  %v266_v45 = vadd.f32 %v265_v42, %v251_v40 }
  0xe7   :  { %v267_v48 = vadd.f32 %v266_v45, %v252_v43  ;;  %v230_v49 = vadd.f32 %v229_v44, %v192_v16 }
  0xe9   :  { %v231_v50 = vadd.f32 %v230_v49, %v195_v31  ;;  %v268_v52 = vadd.f32 %v267_v48, %v253_v47 }
  0xeb   :  { %v232_v55 = vadd.f32 %v347_v13, %v231_v50  ;;  %v269_v56 = vadd.f32 %v268_v52, %v254_v51 }
  0xed   :  { %v270_v58 = vadd.f32 %v269_v56, %v255_v54  ;;  %v233_v59 = vadd.f32 %v348_v22, %v232_v55 }
  0xef   :  { %v234_v61 = vadd.f32 %v233_v59, %v208_v46  ;;  %v271_v63 = vadd.f32 %v270_v58, %v256_v57 }
  0xf1   :  { %v272_v0 = vadd.f32 %v271_v63, %v257_v62  ;;  %v235_v1 = vadd.f32 %v234_v61, %v211_v60 }
  0xf3   :  { %v236_v4 = vadd.f32 %v351_v39, %v235_v1  ;;  %v273_v5 = vadd.f32 %v272_v0, %v258_v2 }
  0xf5   :  { %v237_v7 = vadd.f32 %v352_v53, %v236_v4  ;;  %v274_v8 = vadd.f32 %v273_v5, %v259_v3 }
  0xf7   :  { %v238_v9 = vrot.slane %v237_v7, 4  ;;  %v275_v10 = vadd.f32 %v274_v8, %v260_v6 }
  0xf9   :  { %v239_v11 = vadd.f32 %v238_v9, %v237_v7  ;;  %v276_v12 = vrot.slane %v275_v10, 4 }
  0xfb   :  { %v240_v13 = vrot.slane %v239_v11, 2  ;;  %v277_v14 = vadd.f32 %v276_v12, %v275_v10 }
  0xfd   :  { %v241_v15 = vadd.f32 %v240_v13, %v239_v11  ;;  %v278_v16 = vrot.slane %v277_v14, 2 }
  0xff   :  { %v242_v17 = vrot.slane %v241_v15, 1  ;;  %v279_v18 = vadd.f32 %v278_v16, %v277_v14 }
 0x101   :  { %v243_v19 = vadd.f32 %v242_v17, %v241_v15  ;;  %v280_v20 = vrot.slane %v279_v18, 1 }
 0x103   :  { %244 = vst [vmem:[#allocation2] sm:$0x1] %v243_v19  ;;  %v281_v21 = vadd.f32 %v280_v20, %v279_v18 }
 0x105   :  { %282 = vst [vmem:[#allocation2 + $0x1] sm:$0x1] %v281_v21 }
 0x106   :  { %385 = shalt.err (!%p382_p4)
}
 0x107   :  { %292 = dma.vmem_to_hbm [thread:$0]  %s290_s4, 32, %s461_s2, [#allocation3]  }
 0x108   :  { %394 = dma.done.wait [#allocation3], 32  }
 0x109   :  { %395 = vsyncadd [#allocation3], 4294967264 }
 0x10a   :  { %296 = vsyncpa [#allocation3], 1 }

// kernel: tpu_custom_call.1
= control target key start
LH: loop header
LB: loop body
LE: loop exit
PB: predicated region body
PF: predicated region fallthrough
CT: control target
= control target key end

     0   :  { %vm101_vm0 = vcmask 523264   ;;  %s459_s0 = inlined_call_operand.vmem [shape: bf16[128,64], index: 0, kind: input, shape index: {}]   ;;  %s460_s1 = inlined_call_operand.vmem [shape: bf16[64,128], index: 1, kind: input, shape index: {}]   ;;  %s461_s2 = inlined_call_operand.hbm [shape: f32[1,2,128], index: 2, kind: output, shape index: {}]  }
   0x1   :  { %v362_v0 = vld [vmem:[%s460_s1 + $0x18] sm:$0xff]   ;;  %v363_v1 = vld [vmem:[%s460_s1 + $0x10] sm:$0xff]   ;;  %v364_v2 = vld [vmem:[%s460_s1 + $0x8] sm:$0xff]  }
   0x2   :  { %329 = vmatprep.subr.bf16.mxu0 %v362_v0  ;;  %353 = vmatprep.subr.bf16.mxu1 %v362_v0  ;;  %v366_v3 = vld [vmem:[%s459_s0] sm:$0xff]  }
   0x3   :  { %330 = vmatpush3.bf16.msra.mxu0 %v362_v0  ;;  %357 = vmatpush3.bf16.msra.mxu1 %v362_v0  ;;  %v365_v4 = vld [vmem:[%s460_s1] sm:$0xff]  }
   0x4   :  { %331 = vmatprep.subr.bf16.mxu0 %v363_v1  ;;  %354 = vmatprep.subr.bf16.mxu1 %v363_v1  ;;  %v370_v5 = vld [vmem:[%s459_s0 + $0x20] sm:$0xff]  }
   0x5   :  { %337 = vmatprep.mubr.msk.bf16.mxu0 %vm101_vm0, %v366_v3  ;;  %345 = vmatprep.mubr.msk.bf16.mxu1 %vm101_vm0, %v370_v5 }
   0x7   :  { %332 = vmatpush3.bf16.msra.mxu0 %v363_v1  ;;  %358 = vmatpush3.bf16.msra.mxu1 %v363_v1 }
   0x8   :  { %333 = vmatprep.subr.bf16.mxu0 %v364_v2  ;;  %355 = vmatprep.subr.bf16.mxu1 %v364_v2 }
   0xb   :  { %334 = vmatpush3.bf16.msra.mxu0 %v364_v2  ;;  %359 = vmatpush3.bf16.msra.mxu1 %v364_v2 }
   0xc   :  { %335 = vmatprep.subr.bf16.mxu0 %v365_v4  ;;  %356 = vmatprep.subr.bf16.mxu1 %v365_v4 }
   0xd   :  { %7 = vsyncpa [#allocation3], 0  ;;  %v367_v6 = vld [vmem:[%s459_s0 + $0x8] sm:$0xff]   ;;  %v368_v8 = vld [vmem:[%s459_s0 + $0x10] sm:$0xff]  }
   0xe   :  { %v371_v7 = vld [vmem:[%s459_s0 + $0x28] sm:$0xff]   ;;  %v372_v9 = vld [vmem:[%s459_s0 + $0x30] sm:$0xff]   ;;  %v369_v10 = vld [vmem:[%s459_s0 + $0x18] sm:$0xff]  }
   0xf   :  { %336 = vmatpush3.bf16.msra.mxu0 %v365_v4  ;;  %360 = vmatpush3.bf16.msra.mxu1 %v365_v4  ;;  %v373_v11 = vld [vmem:[%s459_s0 + $0x38] sm:$0xff]   ;;  %s396_s0 = smov [#allocation2]  }
  0x10   :  { %s289_s4 = sshll.u32 %s396_s0, 4  ;;  %s290_s4 = int_to_ptr.vmem [resolvable:$true] %s289_s4 }
  0x11   :  { %s374_s5 = scalar_lea.vmem %s290_s4, 32  ;;  %p379_p1 = scmp.lt.s32.totalorder %s290_s4, %s290_s4 }
  0x12   :  { %338 = vmatmul.mubr.msk.bf16.vlgmr.msra.gmra.mxu0 %vm101_vm0, %v367_v6  ;;  %346 = vmatmul.mubr.msk.bf16.vlgmr.msra.gmra.mxu1 %vm101_vm0, %v371_v7  ;;  %p375_p0 = scmp.ne.s32.totalorder %s290_s4, %s374_s5  ;;  %p380_p2 = scmp.lt.s32.totalorder %s374_s5, %s374_s5 }
  0x13   :  { %341 = vmatprep.mubr.msk.bf16.mxu0 %vm101_vm0, %v368_v8  ;;  %349 = vmatprep.mubr.msk.bf16.mxu1 %vm101_vm0, %v372_v9 }
  0x14   :  { %p381_p3 = por %p380_p2, %p379_p1 }
  0x16   :  { %p382_p4 = pnand %p381_p3, %p375_p0 }
  0x1a   :  { %342 = vmatmul.mubr.msk.bf16.gmra.mxu0 %vm101_vm0, %v369_v10  ;;  %350 = vmatmul.mubr.msk.bf16.gmra.mxu1 %vm101_vm0, %v373_v11 }
  0xd2   :  { %v339_v12 = vpop.f32.mrf.mxu0  ;;  %v347_v13 = vpop.f32.mrf.mxu1 }
  0xd3   :  { %v247_v23 = vmul.f32 %v339_v12, %v339_v12  ;;  %v255_v54 = vmul.f32 %v347_v13, %v347_v13 }
  0xd4   :  { %v160_v14 = vpop.f32.mrf.mxu0  ;;  %v192_v16 = vpop.f32.mrf.mxu1 }
  0xd5   :  { %v245_v18 = vmul.f32 %v160_v14, %v160_v14  ;;  %v253_v47 = vmul.f32 %v192_v16, %v192_v16 }
  0xd6   :  { %v340_v15 = vpop.f32.mrf.mxu0  ;;  %v348_v22 = vpop.f32.mrf.mxu1 }
  0xd7   :  { %v248_v27 = vmul.f32 %v340_v15, %v340_v15  ;;  %v256_v57 = vmul.f32 %v348_v22, %v348_v22 }
  0xd8   :  { %v163_v17 = vpop.f32.mrf.mxu0  ;;  %v195_v31 = vpop.f32.mrf.mxu1 }
  0xd9   :  { %v223_v19 = vadd.f32 %v163_v17, %v160_v14  ;;  %v246_v20 = vmul.f32 %v163_v17, %v163_v17  ;;  %v254_v51 = vmul.f32 %v195_v31, %v195_v31 }
  0xda   :  { %v343_v21 = vpop.f32.mrf.mxu0  ;;  %v351_v39 = vpop.f32.mrf.mxu1 }
  0xdb   :  { %v224_v24 = vadd.f32 %v339_v12, %v223_v19  ;;  %v261_v25 = vadd.f32 %v246_v20, %v245_v18  ;;  %v251_v40 = vmul.f32 %v343_v21, %v343_v21  ;;  %v259_v3 = vmul.f32 %v351_v39, %v351_v39 }
  0xdc   :  { %v176_v26 = vpop.f32.mrf.mxu0  ;;  %v208_v46 = vpop.f32.mrf.mxu1 }
  0xdd   :  { %v262_v28 = vadd.f32 %v261_v25, %v247_v23  ;;  %v225_v29 = vadd.f32 %v340_v15, %v224_v24  ;;  %v249_v33 = vmul.f32 %v176_v26, %v176_v26  ;;  %v257_v62 = vmul.f32 %v208_v46, %v208_v46 }
  0xde   :  { %v344_v30 = vpop.f32.mrf.mxu0  ;;  %v352_v53 = vpop.f32.mrf.mxu1 }
  0xdf   :  { %v226_v32 = vadd.f32 %v225_v29, %v176_v26  ;;  %v263_v34 = vadd.f32 %v262_v28, %v248_v27  ;;  %v252_v43 = vmul.f32 %v344_v30, %v344_v30  ;;  %v260_v6 = vmul.f32 %v352_v53, %v352_v53 }
  0xe0   :  { %v179_v35 = vpop.f32.mrf.mxu0  ;;  %v211_v60 = vpop.f32.mrf.mxu1 }
  0xe1   :  { %v264_v36 = vadd.f32 %v263_v34, %v249_v33  ;;  %v227_v37 = vadd.f32 %v226_v32, %v179_v35  ;;  %v250_v38 = vmul.f32 %v179_v35, %v179_v35  ;;  %v258_v2 = vmul.f32 %v211_v60, %v211_v60 }
  0xe3   :  { %v228_v41 = vadd.f32 %v343_v21, %v227_v37  ;;  %v265_v42 = vadd.f32 %v264_v36, %v250_v38 }
  0xe5   :  { %v229_v44 = vadd.f32 %v344_v30, %v228_v41  ;;  %v266_v45 = vadd.f32 %v265_v42, %v251_v40 }
  0xe7   :  { %v267_v48 = vadd.f32 %v266_v45, %v252_v43  ;;  %v230_v49 = vadd.f32 %v229_v44, %v192_v16 }
  0xe9   :  { %v231_v50 = vadd.f32 %v230_v49, %v195_v31  ;;  %v268_v52 = vadd.f32 %v267_v48, %v253_v47 }
  0xeb   :  { %v232_v55 = vadd.f32 %v347_v13, %v231_v50  ;;  %v269_v56 = vadd.f32 %v268_v52, %v254_v51 }
  0xed   :  { %v270_v58 = vadd.f32 %v269_v56, %v255_v54  ;;  %v233_v59 = vadd.f32 %v348_v22, %v232_v55 }
  0xef   :  { %v234_v61 = vadd.f32 %v233_v59, %v208_v46  ;;  %v271_v63 = vadd.f32 %v270_v58, %v256_v57 }
  0xf1   :  { %v272_v0 = vadd.f32 %v271_v63, %v257_v62  ;;  %v235_v1 = vadd.f32 %v234_v61, %v211_v60 }
  0xf3   :  { %v236_v4 = vadd.f32 %v351_v39, %v235_v1  ;;  %v273_v5 = vadd.f32 %v272_v0, %v258_v2 }
  0xf5   :  { %v237_v7 = vadd.f32 %v352_v53, %v236_v4  ;;  %v274_v8 = vadd.f32 %v273_v5, %v259_v3 }
  0xf7   :  { %v238_v9 = vrot.slane %v237_v7, 4  ;;  %v275_v10 = vadd.f32 %v274_v8, %v260_v6 }
  0xf9   :  { %v239_v11 = vadd.f32 %v238_v9, %v237_v7  ;;  %v276_v12 = vrot.slane %v275_v10, 4 }
  0xfb   :  { %v240_v13 = vrot.slane %v239_v11, 2  ;;  %v277_v14 = vadd.f32 %v276_v12, %v275_v10 }
  0xfd   :  { %v241_v15 = vadd.f32 %v240_v13, %v239_v11  ;;  %v278_v16 = vrot.slane %v277_v14, 2 }
  0xff   :  { %v242_v17 = vrot.slane %v241_v15, 1  ;;  %v279_v18 = vadd.f32 %v278_v16, %v277_v14 }
 0x101   :  { %v243_v19 = vadd.f32 %v242_v17, %v241_v15  ;;  %v280_v20 = vrot.slane %v279_v18, 1 }
 0x103   :  { %244 = vst [vmem:[#allocation2] sm:$0x1] %v243_v19  ;;  %v281_v21 = vadd.f32 %v280_v20, %v279_v18 }
 0x105   :  { %282 = vst [vmem:[#allocation2 + $0x1] sm:$0x1] %v281_v21 }
 0x106   :  { %385 = shalt.err (!%p382_p4)
}
 0x107   :  { %292 = dma.vmem_to_hbm [thread:$0]  %s290_s4, 32, %s461_s2, [#allocation3]  }
 0x108   :  { %394 = dma.done.wait [#allocation3], 32  }
 0x109   :  { %395 = vsyncadd [#allocation3], 4294967264 }
 0x10a   :  { %296 = vsyncpa [#allocation3], 1 }

</bundles_post_ra>
